<compile_context>
chip_gen: v5e
topology: v5e:2x2
jax: 0.10.0
libtpu: 0.0.40
codegen_flags: <defaults>
</compile_context>

<pallas_src>
import math

import numpy as np

import jax
import jax.numpy as jnp
from jax import lax
from jax.experimental import pallas as pl
from jax.experimental.pallas import tpu as pltpu


def _round_up(x: int, m: int) -> int:
    return ((x + m - 1) // m) * m


def _default_target_steps() -> int:
    # On multi-TensorCore chips (v7x: 2 TCs) make sure the batch grid has at
    # least one step per core so dimension_semantics=("parallel",) can shard it.
    try:
        return max(1, int(getattr(jax.devices()[0], "num_cores", 1)))
    except Exception:  # pragma: no cover
        return 1


# ----------------------------------------------------------------------------
# Kernels
# ----------------------------------------------------------------------------
def dqn_kernel(x_ref, w1_ref, b1_ref, w2_ref, b2_ref, o_ref):
    # In-kernel cast of x to the weight dtype (no-op for f32, VPU cast for bf16).
    x = x_ref[...].astype(w1_ref.dtype)
    # fc1 on the MXU with f32 accumulation; bias + ReLU stay in f32 on the VPU.
    h = jnp.dot(x, w1_ref[...], preferred_element_type=jnp.float32)
    h = jnp.maximum(h + b1_ref[...], 0.0)
    h = h.astype(w2_ref.dtype)
    # fc2 on the MXU, f32 accumulation, bias add, lane-dense store.
    q = jnp.dot(h, w2_ref[...], preferred_element_type=jnp.float32) + b2_ref[...]
    o_ref[...] = q.astype(o_ref.dtype)


def make_dqn_select_kernel(n_actions: int):
    """Fused forward + argmax-over-actions (+ max Q) kernel.

    Output is int32 [TB, 1] action index and f32 [TB, 1] max Q value instead of
    the f32 [TB, 128] Q slab — ~64x less HBM writeback in a writeback-bound op.
    """

    def kernel(x_ref, w1_ref, b1_ref, w2_ref, b2_ref, a_ref, qmax_ref):
        x = x_ref[...].astype(w1_ref.dtype)
        h = jnp.dot(x, w1_ref[...], preferred_element_type=jnp.float32)
        h = jnp.maximum(h + b1_ref[...], 0.0)
        h = h.astype(w2_ref.dtype)
        q = jnp.dot(h, w2_ref[...], preferred_element_type=jnp.float32) + b2_ref[...]
        # Mask padded action lanes so they can never win the argmax.
        col = lax.broadcasted_iota(jnp.int32, q.shape, 1)
        valid = col < n_actions
        q = jnp.where(valid, q, -jnp.inf)
        q_max = jnp.max(q, axis=-1, keepdims=True)
        # First index achieving the max (matches argmax tie-breaking).
        idx = jnp.where((q == q_max) & valid, col, q.shape[-1])
        a_ref[...] = jnp.min(idx, axis=-1, keepdims=True).astype(jnp.int32)
        qmax_ref[...] = q_max

    return kernel


# ----------------------------------------------------------------------------
# Shared preparation (padding, tiling, specs)
# ----------------------------------------------------------------------------
def _prepare(x, w1, b1, w2, b2, *, block_b, use_bf16_mxu, row_mult, target_steps):
    B, D = x.shape
    H = w1.shape[1]
    A = w2.shape[1]
    assert w1.shape == (D, H) and b1.shape == (1, H)
    assert w2.shape == (H, A) and b2.shape == (1, A)

    # Lane-pad the action dimension to a full 128-lane multiple (lane-dense
    # compute; padded columns of W2/b2 are zero).
    A_pad = _round_up(max(A, 128), 128)
    if A_pad != A:
        w2 = jnp.pad(w2, ((0, 0), (0, A_pad - A)))
        b2 = jnp.pad(b2, ((0, 0), (0, A_pad - A)))

    # Pre-cast only the tiny resident weights for the bf16 MXU path.  x stays
    # f32 into pallas_call (a wrapper cast would be an extra HBM pass over x).
    if use_bf16_mxu:
        w1 = w1.astype(jnp.bfloat16)
        w2 = w2.astype(jnp.bfloat16)
    b1 = b1.astype(jnp.float32)
    b2 = b2.astype(jnp.float32)

    # Batch tiling with minimal padding: choose the step count first, then the
    # smallest aligned tile that covers B in that many steps.
    n_steps = max(1, pl.cdiv(B, block_b))
    if target_steps is not None and B >= target_steps * row_mult:
        n_steps = max(n_steps, int(target_steps))
    TB = _round_up(pl.cdiv(B, n_steps), row_mult)
    n_steps = pl.cdiv(B, TB)
    B_pad = n_steps * TB
    if B_pad != B:
        x = jnp.pad(x, ((0, B_pad - B), (0, 0)))

    in_specs = [
        pl.BlockSpec((TB, D), lambda i: (i, 0)),      # x: streamed per batch tile
        pl.BlockSpec((D, H), lambda i: (0, 0)),       # w1: resident
        pl.BlockSpec((1, H), lambda i: (0, 0)),       # b1: resident
        pl.BlockSpec((H, A_pad), lambda i: (0, 0)),   # w2: resident
        pl.BlockSpec((1, A_pad), lambda i: (0, 0)),   # b2: resident
    ]
    dims = dict(B=B, D=D, H=H, A=A, A_pad=A_pad, B_pad=B_pad, TB=TB,
                n_steps=n_steps)
    return (x, w1, b1, w2, b2), in_specs, dims


# ----------------------------------------------------------------------------
# Public wrappers
# ----------------------------------------------------------------------------
def linear_dqn_forward(x, w1, b1, w2, b2, *, block_b=2048, use_bf16_mxu=False,
                       out_dtype=jnp.float32, target_steps=None):
    """Fused DQN forward returning Q-values (== relu(x @ w1 + b1) @ w2 + b2).

    x : [B, D] float32; w1: [D, H], b1: [1, H]; w2: [H, A], b2: [1, A].
    Returns [B, A] in `out_dtype` (bf16 halves the dominant output writeback).
    """
    if target_steps is None:
        target_steps = _default_target_steps()
    out_dt = np.dtype(out_dtype)
    row_mult = 16 if (use_bf16_mxu or out_dt.itemsize == 2) else 8

    args, in_specs, d = _prepare(
        x, w1, b1, w2, b2, block_b=block_b, use_bf16_mxu=use_bf16_mxu,
        row_mult=row_mult, target_steps=target_steps)
    B, A, A_pad, B_pad, TB = d["B"], d["A"], d["A_pad"], d["B_pad"], d["TB"]
    D, H = d["D"], d["H"]

    w_itemsize = 2 if use_bf16_mxu else 4
    cost = pl.CostEstimate(
        flops=2 * B_pad * (D * H + H * A_pad),
        transcendentals=0,
        bytes_accessed=(B_pad * D * 4                       # x (f32 in)
                        + D * H * w_itemsize + H * A_pad * w_itemsize
                        + (H + A_pad) * 4                    # biases
                        + B_pad * A_pad * out_dt.itemsize),  # out
    )

    out_padded = pl.pallas_call(
        dqn_kernel,
        out_shape=jax.ShapeDtypeStruct((B_pad, A_pad), out_dtype),
        grid=(d["n_steps"],),
        in_specs=in_specs,
        out_specs=pl.BlockSpec((TB, A_pad), lambda i: (i, 0)),  # lane-dense store
        compiler_params=pltpu.CompilerParams(
            dimension_semantics=("parallel",),
        ),
        cost_estimate=cost,
    )(*args)

    # Strip batch + lane padding.  Under jit this slice fuses into the consumer;
    # for pure action selection prefer linear_dqn_select_action (no Q writeback).
    return out_padded[:B, :A]


def linear_dqn_select_action(x, w1, b1, w2, b2, *, block_b=2048,
                             use_bf16_mxu=False, target_steps=None):
    """Fused forward + argmax: returns (action int32 [B], max_q float32 [B])."""
    if target_steps is None:
        target_steps = _default_target_steps()
    row_mult = 16 if use_bf16_mxu else 8

    args, in_specs, d = _prepare(
        x, w1, b1, w2, b2, block_b=block_b, use_bf16_mxu=use_bf16_mxu,
        row_mult=row_mult, target_steps=target_steps)
    B, A, A_pad, B_pad, TB = d["B"], d["A"], d["A_pad"], d["B_pad"], d["TB"]
    D, H = d["D"], d["H"]

    w_itemsize = 2 if use_bf16_mxu else 4
    cost = pl.CostEstimate(
        flops=2 * B_pad * (D * H + H * A_pad),
        transcendentals=0,
        bytes_accessed=(B_pad * D * 4
                        + D * H * w_itemsize + H * A_pad * w_itemsize
                        + (H + A_pad) * 4
                        + B_pad * 8),                        # int32 idx + f32 maxQ
    )

    a_idx, q_max = pl.pallas_call(
        make_dqn_select_kernel(A),
        out_shape=(jax.ShapeDtypeStruct((B_pad, 1), jnp.int32),
                   jax.ShapeDtypeStruct((B_pad, 1), jnp.float32)),
        grid=(d["n_steps"],),
        in_specs=in_specs,
        out_specs=(pl.BlockSpec((TB, 1), lambda i: (i, 0)),
                   pl.BlockSpec((TB, 1), lambda i: (i, 0))),
        compiler_params=pltpu.CompilerParams(
            dimension_semantics=("parallel",),
        ),
        cost_estimate=cost,
    )(*args)

    return a_idx[:B, 0], q_max[:B, 0]


def init_params(key, input_dims, n_actions, hidden=128):
    """Deterministic init matching PyTorch nn.Linear default (uniform +-1/sqrt(fan_in))."""
    k1, k2, k3, k4 = jax.random.split(key, 4)
    bound1 = 1.0 / math.sqrt(input_dims)
    bound2 = 1.0 / math.sqrt(hidden)
    # Stored as [in, out] for the kernel (PyTorch stores [out, in]).
    w1 = jax.random.uniform(k1, (input_dims, hidden), jnp.float32, -bound1, bound1)
    b1 = jax.random.uniform(k2, (1, hidden), jnp.float32, -bound1, bound1)
    w2 = jax.random.uniform(k3, (hidden, n_actions), jnp.float32, -bound2, bound2)
    b2 = jax.random.uniform(k4, (1, n_actions), jnp.float32, -bound2, bound2)
    return w1, b1, w2, b2


if __name__ == "__main__":
    input_dims = 16
    n_actions = 4

    key = jax.random.PRNGKey(0)
    key_x, key_x2, key_p = jax.random.split(key, 3)
    w1, b1, w2, b2 = init_params(key_p, input_dims, n_actions)

    # --- small batch (single-step action selection) ---------------------------
    x_small = jax.random.normal(key_x, (8, input_dims), dtype=jnp.float32)
    ref_small = jnp.maximum(x_small @ w1 + b1, 0.0) @ w2 + b2
    q_small = jax.block_until_ready(linear_dqn_forward(x_small, w1, b1, w2, b2))
    assert q_small.shape == (8, n_actions)
    assert jnp.allclose(q_small, ref_small, atol=1e-5, rtol=1e-5)

    # --- larger, non-multiple batch: exercises batch grid + minimal padding ---
    x_big = jax.random.normal(key_x2, (300, input_dims), dtype=jnp.float32)
    ref_big = jnp.maximum(x_big @ w1 + b1, 0.0) @ w2 + b2

    q_big = jax.block_until_ready(
        linear_dqn_forward(x_big, w1, b1, w2, b2, block_b=128)
    )
    assert q_big.shape == (300, n_actions)
    assert jnp.allclose(q_big, ref_big, atol=1e-5, rtol=1e-5)

    # --- bf16 MXU path (weights pre-cast, x cast in-kernel), f32 output -------
    q_bf16 = jax.block_until_ready(
        linear_dqn_forward(x_big, w1, b1, w2, b2, block_b=128, use_bf16_mxu=True)
    )
    assert jnp.allclose(q_bf16, ref_big, atol=5e-2, rtol=5e-2)

    # --- bf16 output path (halved writeback when full Q-values are needed) ----
    q_out16 = jax.block_until_ready(
        linear_dqn_forward(x_big, w1, b1, w2, b2, out_dtype=jnp.bfloat16)
    )
    assert q_out16.dtype == jnp.bfloat16
    assert jnp.allclose(q_out16.astype(jnp.float32), ref_big, atol=5e-2, rtol=5e-2)

    # --- fused argmax action selection (8 B/row writeback instead of 512) -----
    a_idx, q_max = jax.block_until_ready(
        linear_dqn_select_action(x_big, w1, b1, w2, b2, block_b=128)
    )
    assert a_idx.shape == (300,) and q_max.shape == (300,)
    assert jnp.array_equal(a_idx, jnp.argmax(ref_big, axis=-1).astype(jnp.int32))
    assert jnp.allclose(q_max, jnp.max(ref_big, axis=-1), atol=1e-5, rtol=1e-5)

    # TODO(synk): Adam optimizer / MSE loss / backward pass from the PyTorch
    # module are training machinery, intentionally not part of this forward kernel.

    print("KERNEL_OK")
</pallas_src>

<mosaic_0001>
module attributes {stable_mosaic.version = 11 : i64} {
  func.func @dqn_kernel(%arg0: i32, %arg1: memref<8x16xf32, #tpu.memory_space<vmem>>, %arg2: memref<16x128xf32, #tpu.memory_space<vmem>>, %arg3: memref<1x128xf32, #tpu.memory_space<vmem>>, %arg4: memref<128x128xf32, #tpu.memory_space<vmem>>, %arg5: memref<1x128xf32, #tpu.memory_space<vmem>>, %arg6: memref<8x128xf32, #tpu.memory_space<vmem>>) attributes {dimension_semantics = [#tpu.dimension_semantics<parallel>], iteration_bounds = array<i64: 1>, scalar_prefetch = 0 : i64, scratch_operands = 0 : i64, tpu.core_type = #tpu.core_type<tc>, window_params = [{transform_indices = @transform_0, window_bounds = array<i64: 8, 16>}, {pipeline_mode = #tpu.pipeline_mode<synchronous>, transform_indices = @transform_1, window_bounds = array<i64: 16, 128>}, {pipeline_mode = #tpu.pipeline_mode<synchronous>, transform_indices = @transform_2, window_bounds = array<i64: 1, 128>}, {pipeline_mode = #tpu.pipeline_mode<synchronous>, transform_indices = @transform_3, window_bounds = array<i64: 128, 128>}, {pipeline_mode = #tpu.pipeline_mode<synchronous>, transform_indices = @transform_4, window_bounds = array<i64: 1, 128>}, {transform_indices = @transform_5, window_bounds = array<i64: 8, 128>}]} {
    %c0 = arith.constant 0 : index
    %c0_0 = arith.constant 0 : index
    %0 = vector.load %arg1[%c0, %c0_0] : memref<8x16xf32, #tpu.memory_space<vmem>>, vector<8x16xf32>
    %c0_1 = arith.constant 0 : index
    %c0_2 = arith.constant 0 : index
    %1 = vector.load %arg2[%c0_1, %c0_2] : memref<16x128xf32, #tpu.memory_space<vmem>>, vector<16x128xf32>
    %cst = arith.constant dense<0.000000e+00> : vector<8x128xf32>
    %2 = tpu.matmul %0, %1, %cst {dimension_numbers = #tpu.dot_dimension_numbers<[1], [0], [0], [1], [0, 0, 1, 1], [], []>} : vector<8x16xf32>, vector<16x128xf32>, vector<8x128xf32> -> vector<8x128xf32>
    %c0_3 = arith.constant 0 : index
    %c0_4 = arith.constant 0 : index
    %3 = vector.load %arg3[%c0_3, %c0_4] : memref<1x128xf32, #tpu.memory_space<vmem>>, vector<1x128xf32>
    %4 = vector.broadcast %3 : vector<1x128xf32> to vector<8x128xf32>
    %5 = arith.addf %2, %4 : vector<8x128xf32>
    %cst_5 = arith.constant 0.000000e+00 : f32
    %6 = vector.broadcast %cst_5 : f32 to vector<8x128xf32>
    %7 = arith.maximumf %5, %6 : vector<8x128xf32>
    %c0_6 = arith.constant 0 : index
    %c0_7 = arith.constant 0 : index
    %8 = vector.load %arg4[%c0_6, %c0_7] : memref<128x128xf32, #tpu.memory_space<vmem>>, vector<128x128xf32>
    %cst_8 = arith.constant dense<0.000000e+00> : vector<8x128xf32>
    %9 = tpu.matmul %7, %8, %cst_8 {dimension_numbers = #tpu.dot_dimension_numbers<[1], [0], [0], [1], [0, 0, 1, 1], [], []>} : vector<8x128xf32>, vector<128x128xf32>, vector<8x128xf32> -> vector<8x128xf32>
    %c0_9 = arith.constant 0 : index
    %c0_10 = arith.constant 0 : index
    %10 = vector.load %arg5[%c0_9, %c0_10] : memref<1x128xf32, #tpu.memory_space<vmem>>, vector<1x128xf32>
    %11 = vector.broadcast %10 : vector<1x128xf32> to vector<8x128xf32>
    %12 = arith.addf %9, %11 : vector<8x128xf32>
    %c0_11 = arith.constant 0 : index
    %c0_12 = arith.constant 0 : index
    %13 = vector.load %arg6[%c0_11, %c0_12] : memref<8x128xf32, #tpu.memory_space<vmem>>, vector<8x128xf32>
    tpu.vector_store %arg6[%c0_11, %c0_12], %12 {strides = array<i32>} : memref<8x128xf32, #tpu.memory_space<vmem>>, vector<8x128xf32>,
    return
  }
  func.func @transform_0(%arg0: i32) -> (i32, i32) {
    %c0_i32 = arith.constant 0 : i32
    %c0_i32_0 = arith.constant 0 : i32
    return %arg0, %c0_i32 : i32, i32
  }
  func.func @transform_1(%arg0: i32) -> (i32, i32) {
    %c0_i32 = arith.constant 0 : i32
    %c0_i32_0 = arith.constant 0 : i32
    %c0_i32_1 = arith.constant 0 : i32
    return %c0_i32, %c0_i32_0 : i32, i32
  }
  func.func @transform_2(%arg0: i32) -> (i32, i32) {
    %c0_i32 = arith.constant 0 : i32
    %c0_i32_0 = arith.constant 0 : i32
    %c0_i32_1 = arith.constant 0 : i32
    return %c0_i32, %c0_i32_0 : i32, i32
  }
  func.func @transform_3(%arg0: i32) -> (i32, i32) {
    %c0_i32 = arith.constant 0 : i32
    %c0_i32_0 = arith.constant 0 : i32
    %c0_i32_1 = arith.constant 0 : i32
    return %c0_i32, %c0_i32_0 : i32, i32
  }
  func.func @transform_4(%arg0: i32) -> (i32, i32) {
    %c0_i32 = arith.constant 0 : i32
    %c0_i32_0 = arith.constant 0 : i32
    %c0_i32_1 = arith.constant 0 : i32
    return %c0_i32, %c0_i32_0 : i32, i32
  }
  func.func @transform_5(%arg0: i32) -> (i32, i32) {
    %c0_i32 = arith.constant 0 : i32
    %c0_i32_0 = arith.constant 0 : i32
    return %arg0, %c0_i32 : i32, i32
  }
}

</mosaic_0001>

<bundles_post_ra>
// kernel: tpu_custom_call.1
= control target key start
LH: loop header
LB: loop body
LE: loop exit
PB: predicated region body
PF: predicated region fallthrough
CT: control target
= control target key end

     0   :  { %10 = vsyncpa [#allocation3], 0  ;;  %s322_s0 = inlined_call_operand.hbm [shape: f32[8,16], index: 0, kind: input, shape index: {}]   ;;  %s323_s1 = inlined_call_operand.hbm [shape: f32[16,128], index: 1, kind: input, shape index: {}]   ;;  %s324_s2 = inlined_call_operand.vmem [shape: f32[1,128], index: 2, kind: input, shape index: {}]   ;;  %s325_s3 = inlined_call_operand.hbm [shape: f32[128,128], index: 3, kind: input, shape index: {}]   ;;  %s326_s4 = inlined_call_operand.vmem [shape: f32[1,128], index: 4, kind: input, shape index: {}]   ;;  %s327_s5 = inlined_call_operand.hbm [shape: f32[8,128], index: 5, kind: output, shape index: {}]  }
   0x1   :  { %11 = vsyncpa [#allocation6], 0  ;;  %s28_s20 = sshll.u32 %s323_s1, 4  ;;  %s29_s20 = int_to_ptr.hbm [resolvable:$true] %s28_s20 }
   0x2   :  { %12 = vsyncpa [#allocation4], 0  ;;  %s268_s21 = smov [#allocation5]   ;;  %s18_s25 = sshll.u32 %s322_s0, 4  ;;  %s19_s25 = int_to_ptr.hbm [resolvable:$true] %s18_s25 }
   0x3   :  { %s30_s22 = sshll.u32 %s268_s21, 4  ;;  %s269_s26 = smov 128   ;;  %s31_s22 = int_to_ptr.vmem [resolvable:$true] %s30_s22 }
   0x4   :  { %s270_s27 = smov 8   ;;  %s271_s28 = smov [#allocation2]  }
   0x5   :  { %36 = dma.hbm_to_vmem [thread:$0]  %s29_s20, 256, %s31_s22, [#allocation6], %s269_s26, %s269_s26, %s270_s27  }
   0x6   :  { %s20_s29 = sshll.u32 %s271_s28, 4  ;;  %s43_s7 = sshll.u32 %s325_s3, 4  ;;  %s21_s29 = int_to_ptr.vmem [resolvable:$true] %s20_s29  ;;  %s44_s7 = int_to_ptr.hbm [resolvable:$true] %s43_s7 }
   0x7   :  { %23 = dma.hbm_to_vmem [thread:$0]  %s19_s25, 128, %s21_s29, [#allocation3]  }
   0x8   :  { %s272_s1 = smov [#allocation7]  }
   0x9   :  { %s45_s8 = sshll.u32 %s272_s1, 4  ;;  %s46_s8 = int_to_ptr.vmem [resolvable:$true] %s45_s8 }
   0xa   :  { %51 = dma.hbm_to_vmem [thread:$0]  %s44_s7, 2048, %s46_s8, [#allocation6], %s269_s26, %s269_s26, %s270_s27  }
   0xb   :  { %262 = dma.done.wait [#allocation3], 128  }
   0xc   :  { %263 = vsyncadd [#allocation3], 4294967168 }
   0xd   :  { %264 = dma.done.wait [#allocation6], 2304  }
   0xe   :  { %265 = vsyncadd [#allocation6], 4294964992  ;;  %v68_v0 = vld [vmem:[#allocation5 + $0x8] sm:$0xff]  ;;  %v67_v1 = vld [vmem:[#allocation5] sm:$0xff]  ;;  %vm73_vm0 = vcmask 130048   ;;  %s273_s11 = smov [#allocation8]  }
   0xf   :  { %91 = vmatpush.msra.mxu0 %v68_v0  ;;  %v66_v2 = vld [vmem:[#allocation2] sm:$0xff]  ;;  %v113_v3 = vld [vmem:[#allocation7 + $0x78] sm:$0xff]  ;;  %v112_v4 = vld [vmem:[#allocation7 + $0x70] sm:$0xff]  ;;  %s144_s12 = sshll.u32 %s273_s11, 4  ;;  %s146_s15 = sshll.u32 %s327_s5, 4  ;;  %s145_s12 = int_to_ptr.vmem [resolvable:$true] %s144_s12  ;;  %s147_s15 = int_to_ptr.hbm [resolvable:$true] %s146_s15 }
  0x10   :  { %118 = vmatpush.msra.mxu1 %v113_v3  ;;  %v111_v5 = vld [vmem:[#allocation7 + $0x68] sm:$0xff]  ;;  %v110_v6 = vld [vmem:[#allocation7 + $0x60] sm:$0xff]  ;;  %v109_v7 = vld [vmem:[#allocation7 + $0x58] sm:$0xff] }
  0x11   :  { %92 = vmatpush.msra.mxu0 %v67_v1  ;;  %v108_v8 = vld [vmem:[#allocation7 + $0x50] sm:$0xff]  ;;  %v107_v9 = vld [vmem:[#allocation7 + $0x48] sm:$0xff]  ;;  %v106_v10 = vld [vmem:[#allocation7 + $0x40] sm:$0xff] }
  0x12   :  { %157 = vmatmul.msk.f32.vlgmr.msra.gmra.mxu0 %vm73_vm0, %v66_v2  ;;  %119 = vmatpush.msra.mxu1 %v112_v4  ;;  %v105_v11 = vld [vmem:[#allocation7 + $0x38] sm:$0xff]  ;;  %v104_v12 = vld [vmem:[#allocation7 + $0x30] sm:$0xff]  ;;  %v103_v13 = vld [vmem:[#allocation7 + $0x28] sm:$0xff] }
  0x13   :  { %v102_v14 = vld [vmem:[#allocation7 + $0x20] sm:$0xff]  ;;  %v101_v15 = vld [vmem:[#allocation7 + $0x18] sm:$0xff]  ;;  %v100_v16 = vld [vmem:[#allocation7 + $0x10] sm:$0xff] }
  0x14   :  { %120 = vmatpush.msra.mxu1 %v111_v5  ;;  %v99_v17 = vld [vmem:[#allocation7 + $0x8] sm:$0xff]  ;;  %v98_v18 = vld [vmem:[#allocation7] sm:$0xff] }
  0x15   :  { %v164_v19 = vld [vmem:[%s324_s2] ss:$0 sm:$0xff] }
  0x16   :  { %121 = vmatpush.msra.mxu1 %v110_v6  ;;  %v165_v23 = vld [vmem:[%s326_s4] ss:$0 sm:$0xff] }
  0x18   :  { %122 = vmatpush.msra.mxu1 %v109_v7 }
  0x1a   :  { %123 = vmatpush.msra.mxu1 %v108_v8 }
  0x1c   :  { %124 = vmatpush.msra.mxu1 %v107_v9 }
  0x1e   :  { %125 = vmatpush.msra.mxu1 %v106_v10 }
  0x20   :  { %126 = vmatpush.msra.mxu1 %v105_v11 }
  0x22   :  { %127 = vmatpush.msra.mxu1 %v104_v12 }
  0x24   :  { %128 = vmatpush.msra.mxu1 %v103_v13 }
  0x26   :  { %129 = vmatpush.msra.mxu1 %v102_v14 }
  0x28   :  { %130 = vmatpush.msra.mxu1 %v101_v15 }
  0x2a   :  { %131 = vmatpush.msra.mxu1 %v100_v16 }
  0x2c   :  { %132 = vmatpush.msra.mxu1 %v99_v17 }
  0x2e   :  { %133 = vmatpush.msra.mxu1 %v98_v18 }
  0x8f   :  { %v94_v20 = vpop.f32.mrf.mxu0 }
  0x90   :  { %v95_v21 = vadd.f32 %v164_v19, %v94_v20 }
  0x92   :  { %v97_v22 = vmax.f32 %v95_v21, 0.0 }
  0x94   :  { %134 = vmatmul.f32.vlgmr.msra.gmra.mxu1 %v97_v22 }
 0x111   :  { %v135_v24 = vpop.f32.mrf.mxu1 }
 0x112   :  { %v136_v25 = vadd.f32 %v165_v23, %v135_v24 }
 0x114   :  { %138 = vst [vmem:[#allocation8] sm:$0xff] %v136_v25 }
 0x115   :  { %149 = dma.vmem_to_hbm [thread:$0]  %s145_s12, 128, %s147_s15, [#allocation4]  }
 0x116   :  { %266 = dma.done.wait [#allocation4], 128  }
 0x117   :  { %267 = vsyncadd [#allocation4], 4294967168 }
 0x118   :  { %154 = vsyncpa [#allocation3], 1 }
 0x119   :  { %155 = vsyncpa [#allocation6], 1 }
 0x11a   :  { %156 = vsyncpa [#allocation4], 1 }

</bundles_post_ra>
